<compile_context>
chip_gen: v6e
topology: v6e:2x2x1
jax: 0.10.0
libtpu: 0.0.40
codegen_flags: <defaults>
</compile_context>

<pallas_src>
import functools

import jax
import jax.numpy as jnp
from jax.experimental import pallas as pl
from jax.experimental.pallas import tpu as pltpu

LANE = 128  # TPU lane width; hidden/head lane padding target.


def ppo_fused_kernel(x_ref, w1_ref, b1_ref, w2_ref, b2_ref, wh_ref, bh_ref,
                     out_ref, *, action_dim):
    mm_dtype = w1_ref.dtype  # f32 or bf16 (MXU input dtype); accum is always f32
    x = x_ref[...].astype(mm_dtype)

    # Feature extractor: Linear -> ReLU -> (Dropout = identity) -> Linear -> ReLU
    h1 = jnp.dot(x, w1_ref[...], preferred_element_type=jnp.float32) + b1_ref[...]
    h1 = jnp.maximum(h1, 0.0)
    h2 = jnp.dot(h1.astype(mm_dtype), w2_ref[...],
                 preferred_element_type=jnp.float32) + b2_ref[...]
    h2 = jnp.maximum(h2, 0.0)

    # Fused heads: one MXU matmul producing [policy logits | value | zero pad].
    head = jnp.dot(h2.astype(mm_dtype), wh_ref[...],
                   preferred_element_type=jnp.float32) + bh_ref[...]

    col = jax.lax.broadcasted_iota(jnp.int32, head.shape, 1)
    is_action = col < action_dim

    # Softmax over the first `action_dim` lanes only (padded lanes -> -inf -> 0).
    logits = jnp.where(is_action, head, -jnp.inf)
    m = jnp.max(logits, axis=-1, keepdims=True)
    e = jnp.exp(logits - m)
    denom = jnp.sum(e, axis=-1, keepdims=True)
    # Exact divide (NOT approx reciprocal): PPO uses these probs for sampling
    # and log-prob ratios, and they must sum to 1 to float precision.
    probs = e / denom

    # Single lane-dense store: probs in [0:action_dim], value in lane
    # action_dim, zeros elsewhere (probs is already exactly 0 in padded lanes).
    out_ref[...] = jnp.where(col == action_dim, head, probs)


def pack_params(params, obs_dim, hidden_dim, action_dim,
                param_dtype=jnp.float32):
    """Host-side (one-time) padding + head fusion of natural-layout params.

    * hidden_dim is zero-padded to a multiple of 128 lanes (numerically
      identity: ReLU(0) = 0 contributes nothing downstream).
    * obs_dim is NOT padded (streams naturally).
    * policy + value heads fused: columns [0:action_dim] = policy weights,
      column action_dim = value weights; bias row carries bv in that lane.
    * Matmul weights optionally stored in bf16 (MXU-native on v6e/v7x);
      biases stay f32 since they add into the f32 accumulator.
    """
    hid_pad = pl.cdiv(hidden_dim, LANE) * LANE
    head_pad = LANE
    assert action_dim + 1 <= head_pad

    w1 = jnp.zeros((obs_dim, hid_pad), jnp.float32)
    w1 = w1.at[:, :hidden_dim].set(params["w1"].astype(jnp.float32))
    b1 = jnp.zeros((1, hid_pad), jnp.float32)
    b1 = b1.at[:, :hidden_dim].set(params["b1"].reshape(1, hidden_dim))

    w2 = jnp.zeros((hid_pad, hid_pad), jnp.float32)
    w2 = w2.at[:hidden_dim, :hidden_dim].set(params["w2"].astype(jnp.float32))
    b2 = jnp.zeros((1, hid_pad), jnp.float32)
    b2 = b2.at[:, :hidden_dim].set(params["b2"].reshape(1, hidden_dim))

    wh = jnp.zeros((hid_pad, head_pad), jnp.float32)
    wh = wh.at[:hidden_dim, :action_dim].set(params["wp"].astype(jnp.float32))
    wh = wh.at[:hidden_dim, action_dim:action_dim + 1].set(
        params["wv"].astype(jnp.float32))
    bh = jnp.zeros((1, head_pad), jnp.float32)
    bh = bh.at[0, action_dim].set(params["bv"].reshape(()))

    return {
        "w1": w1.astype(param_dtype), "b1": b1,
        "w2": w2.astype(param_dtype), "b2": b2,
        "wh": wh.astype(param_dtype), "bh": bh,
    }


def _choose_tile_b(batch):
    """Row-tile size: as large as possible (per-grid-step overhead dominates
    this tiny per-tile compute), but keep >= 2 grid steps whenever the batch
    allows so the 'parallel' row axis can shard across both v7x TensorCores."""
    for t in (512, 256, 128):
        if batch >= 2 * t:
            return t
    if batch <= 8:
        return 8
    half = (batch + 1) // 2
    return ((half + 7) // 8) * 8  # two ~equal 8-aligned tiles


def ppo_forward(x, packed, action_dim):
    """x: (B, obs_dim) float32, packed: output of pack_params.
    Returns (probs (B, action_dim), value (B, 1))."""
    B, obs_dim = x.shape
    assert obs_dim == packed["w1"].shape[0]
    hid_pad = packed["w1"].shape[1]
    head_pad = packed["wh"].shape[1]

    # Batch tiling: rows tile, weights stay VMEM-resident across grid steps.
    tile_b = _choose_tile_b(B)
    b_pad = pl.cdiv(B, tile_b) * tile_b
    x_p = x if b_pad == B else jnp.zeros((b_pad, obs_dim), x.dtype).at[:B].set(x)

    full = lambda i: (0, 0)
    rows = lambda i: (i, 0)

    flops = 2 * b_pad * (obs_dim * hid_pad + hid_pad * hid_pad + hid_pad * head_pad)
    transcendentals = b_pad * head_pad  # exp in the softmax
    bytes_w = sum(int(packed[k].size) * packed[k].dtype.itemsize
                  for k in ("w1", "b1", "w2", "b2", "wh", "bh"))
    bytes_accessed = (int(x_p.size) * x_p.dtype.itemsize + bytes_w
                      + b_pad * head_pad * 4)

    out = pl.pallas_call(
        functools.partial(ppo_fused_kernel, action_dim=action_dim),
        out_shape=jax.ShapeDtypeStruct((b_pad, head_pad), jnp.float32),
        grid_spec=pltpu.PrefetchScalarGridSpec(
            num_scalar_prefetch=0,
            grid=(b_pad // tile_b,),
            in_specs=[
                pl.BlockSpec((tile_b, obs_dim), rows),   # x (unpadded lanes)
                pl.BlockSpec((obs_dim, hid_pad), full),  # W1
                pl.BlockSpec((1, hid_pad), full),        # b1
                pl.BlockSpec((hid_pad, hid_pad), full),  # W2
                pl.BlockSpec((1, hid_pad), full),        # b2
                pl.BlockSpec((hid_pad, head_pad), full), # fused heads weight
                pl.BlockSpec((1, head_pad), full),       # fused heads bias (bv)
            ],
            out_specs=pl.BlockSpec((tile_b, head_pad), rows),
        ),
        compiler_params=pltpu.CompilerParams(
            dimension_semantics=("parallel",),
            vmem_limit_bytes=32 * 1024 * 1024,
        ),
        cost_estimate=pl.CostEstimate(
            flops=flops,
            transcendentals=transcendentals,
            bytes_accessed=bytes_accessed,
        ),
    )(x_p, packed["w1"], packed["b1"], packed["w2"], packed["b2"],
      packed["wh"], packed["bh"])

    probs = out[:B, :action_dim]
    value = out[:B, action_dim:action_dim + 1]
    return probs, value


def init_params(key, obs_dim, hidden_dim, action_dim):
    """Deterministic synthetic init (PyTorch-like uniform fan-in scaling),
    natural (unpadded, unfused) layout."""
    ks = jax.random.split(key, 7)

    def lin(k, fan_in, fan_out):
        bound = 1.0 / jnp.sqrt(fan_in)
        return jax.random.uniform(k, (fan_in, fan_out), jnp.float32, -bound, bound)

    return {
        "w1": lin(ks[0], obs_dim, hidden_dim),
        "b1": lin(ks[1], obs_dim, hidden_dim)[:1, :],      # (1, hidden)
        "w2": lin(ks[2], hidden_dim, hidden_dim),
        "b2": lin(ks[3], hidden_dim, hidden_dim)[:1, :],   # (1, hidden)
        "wp": lin(ks[4], hidden_dim, action_dim),          # policy head, no bias
        "wv": lin(ks[5], hidden_dim, 1),
        "bv": lin(ks[6], hidden_dim, 1)[:1, :],            # (1, 1)
    }


if __name__ == "__main__":
    B, OBS_DIM, HIDDEN_DIM, ACTION_DIM = 8, 4, 64, 4

    key = jax.random.PRNGKey(0)
    k_x, k_p = jax.random.split(key)
    x = jax.random.normal(k_x, (B, OBS_DIM), dtype=jnp.float32)
    params = init_params(k_p, OBS_DIM, HIDDEN_DIM, ACTION_DIM)

    # Pure-JAX reference (natural f32 params).
    h1 = jnp.maximum(x @ params["w1"] + params["b1"], 0.0)
    h2 = jnp.maximum(h1 @ params["w2"] + params["b2"], 0.0)
    ref_probs = jax.nn.softmax(h2 @ params["wp"], axis=1)
    ref_value = h2 @ params["wv"] + params["bv"]

    fwd = jax.jit(functools.partial(ppo_forward, action_dim=ACTION_DIM))

    # --- f32 path (matches PyTorch eval semantics) ---
    packed_f32 = pack_params(params, OBS_DIM, HIDDEN_DIM, ACTION_DIM,
                             param_dtype=jnp.float32)
    probs, value = fwd(x, packed_f32)
    jax.block_until_ready((probs, value))

    assert probs.shape == (B, ACTION_DIM) and value.shape == (B, 1)
    assert jnp.allclose(probs, ref_probs, atol=2e-3, rtol=2e-3)
    assert jnp.allclose(value, ref_value, atol=2e-3, rtol=2e-3)
    # Exact divide in the kernel -> probabilities sum to 1 to float rounding.
    assert jnp.allclose(jnp.sum(probs, axis=1), 1.0, atol=1e-4)

    # --- bf16 matmul path (v6e/v7x MXU-native rate; softmax/value math in f32) ---
    packed_bf16 = pack_params(params, OBS_DIM, HIDDEN_DIM, ACTION_DIM,
                              param_dtype=jnp.bfloat16)
    probs_bf, value_bf = fwd(x, packed_bf16)
    jax.block_until_ready((probs_bf, value_bf))

    assert jnp.allclose(probs_bf, ref_probs, atol=3e-2, rtol=3e-2)
    assert jnp.allclose(value_bf, ref_value, atol=3e-2, rtol=3e-2)
    assert jnp.allclose(jnp.sum(probs_bf, axis=1), 1.0, atol=1e-4)

    print("KERNEL_OK")
</pallas_src>

<mosaic_0001>
module attributes {stable_mosaic.version = 11 : i64} {
  func.func @ppo_fused_kernel(%arg0: i32, %arg1: memref<8x4xf32, #tpu.memory_space<vmem>>, %arg2: memref<4x128xf32, #tpu.memory_space<vmem>>, %arg3: memref<1x128xf32, #tpu.memory_space<vmem>>, %arg4: memref<128x128xf32, #tpu.memory_space<vmem>>, %arg5: memref<1x128xf32, #tpu.memory_space<vmem>>, %arg6: memref<128x128xf32, #tpu.memory_space<vmem>>, %arg7: memref<1x128xf32, #tpu.memory_space<vmem>>, %arg8: memref<8x128xf32, #tpu.memory_space<vmem>>) attributes {dimension_semantics = [#tpu.dimension_semantics<parallel>], iteration_bounds = array<i64: 1>, scalar_prefetch = 0 : i64, scratch_operands = 0 : i64, tpu.core_type = #tpu.core_type<tc>, window_params = [{transform_indices = @transform_0, window_bounds = array<i64: 8, 4>}, {pipeline_mode = #tpu.pipeline_mode<synchronous>, transform_indices = @transform_1, window_bounds = array<i64: 4, 128>}, {pipeline_mode = #tpu.pipeline_mode<synchronous>, transform_indices = @transform_2, window_bounds = array<i64: 1, 128>}, {pipeline_mode = #tpu.pipeline_mode<synchronous>, transform_indices = @transform_3, window_bounds = array<i64: 128, 128>}, {pipeline_mode = #tpu.pipeline_mode<synchronous>, transform_indices = @transform_4, window_bounds = array<i64: 1, 128>}, {pipeline_mode = #tpu.pipeline_mode<synchronous>, transform_indices = @transform_5, window_bounds = array<i64: 128, 128>}, {pipeline_mode = #tpu.pipeline_mode<synchronous>, transform_indices = @transform_6, window_bounds = array<i64: 1, 128>}, {transform_indices = @transform_7, window_bounds = array<i64: 8, 128>}]} {
    %c0 = arith.constant 0 : index
    %c0_0 = arith.constant 0 : index
    %0 = vector.load %arg1[%c0, %c0_0] : memref<8x4xf32, #tpu.memory_space<vmem>>, vector<8x4xf32>
    %c0_1 = arith.constant 0 : index
    %c0_2 = arith.constant 0 : index
    %1 = vector.load %arg2[%c0_1, %c0_2] : memref<4x128xf32, #tpu.memory_space<vmem>>, vector<4x128xf32>
    %cst = arith.constant dense<0.000000e+00> : vector<8x128xf32>
    %2 = tpu.matmul %0, %1, %cst {dimension_numbers = #tpu.dot_dimension_numbers<[1], [0], [0], [1], [0, 0, 1, 1], [], []>} : vector<8x4xf32>, vector<4x128xf32>, vector<8x128xf32> -> vector<8x128xf32>
    %c0_3 = arith.constant 0 : index
    %c0_4 = arith.constant 0 : index
    %3 = vector.load %arg3[%c0_3, %c0_4] : memref<1x128xf32, #tpu.memory_space<vmem>>, vector<1x128xf32>
    %4 = vector.broadcast %3 : vector<1x128xf32> to vector<8x128xf32>
    %5 = arith.addf %2, %4 : vector<8x128xf32>
    %cst_5 = arith.constant 0.000000e+00 : f32
    %6 = vector.broadcast %cst_5 : f32 to vector<8x128xf32>
    %7 = arith.maximumf %5, %6 : vector<8x128xf32>
    %c0_6 = arith.constant 0 : index
    %c0_7 = arith.constant 0 : index
    %8 = vector.load %arg4[%c0_6, %c0_7] : memref<128x128xf32, #tpu.memory_space<vmem>>, vector<128x128xf32>
    %cst_8 = arith.constant dense<0.000000e+00> : vector<8x128xf32>
    %9 = tpu.matmul %7, %8, %cst_8 {dimension_numbers = #tpu.dot_dimension_numbers<[1], [0], [0], [1], [0, 0, 1, 1], [], []>} : vector<8x128xf32>, vector<128x128xf32>, vector<8x128xf32> -> vector<8x128xf32>
    %c0_9 = arith.constant 0 : index
    %c0_10 = arith.constant 0 : index
    %10 = vector.load %arg5[%c0_9, %c0_10] : memref<1x128xf32, #tpu.memory_space<vmem>>, vector<1x128xf32>
    %11 = vector.broadcast %10 : vector<1x128xf32> to vector<8x128xf32>
    %12 = arith.addf %9, %11 : vector<8x128xf32>
    %cst_11 = arith.constant 0.000000e+00 : f32
    %13 = vector.broadcast %cst_11 : f32 to vector<8x128xf32>
    %14 = arith.maximumf %12, %13 : vector<8x128xf32>
    %c0_12 = arith.constant 0 : index
    %c0_13 = arith.constant 0 : index
    %15 = vector.load %arg6[%c0_12, %c0_13] : memref<128x128xf32, #tpu.memory_space<vmem>>, vector<128x128xf32>
    %cst_14 = arith.constant dense<0.000000e+00> : vector<8x128xf32>
    %16 = tpu.matmul %14, %15, %cst_14 {dimension_numbers = #tpu.dot_dimension_numbers<[1], [0], [0], [1], [0, 0, 1, 1], [], []>} : vector<8x128xf32>, vector<128x128xf32>, vector<8x128xf32> -> vector<8x128xf32>
    %c0_15 = arith.constant 0 : index
    %c0_16 = arith.constant 0 : index
    %17 = vector.load %arg7[%c0_15, %c0_16] : memref<1x128xf32, #tpu.memory_space<vmem>>, vector<1x128xf32>
    %18 = vector.broadcast %17 : vector<1x128xf32> to vector<8x128xf32>
    %19 = arith.addf %16, %18 : vector<8x128xf32>
    %20 = tpu.iota {dimensions = array<i32: 1>} : vector<8x128xi32>
    %c4_i32 = arith.constant 4 : i32
    %21 = vector.broadcast %c4_i32 : i32 to vector<8x128xi32>
    %22 = arith.cmpi slt, %20, %21 : vector<8x128xi32>
    %cst_17 = arith.constant 0xFF800000 : f32
    %23 = vector.broadcast %cst_17 : f32 to vector<8x128xf32>
    %24 = arith.select %22, %19, %23 : vector<8x128xi1>, vector<8x128xf32>
    %cst_18 = arith.constant dense<0xFF800000> : vector<8xf32>
    %25 = vector.multi_reduction <maximumf>, %24, %cst_18 [1] : vector<8x128xf32> to vector<8xf32>
    %26 = vector.shape_cast %25 : vector<8xf32> to vector<8x1xf32>
    %27 = vector.broadcast %26 : vector<8x1xf32> to vector<8x128xf32>
    %28 = arith.subf %24, %27 : vector<8x128xf32>
    %29 = math.exp %28 : vector<8x128xf32>
    %cst_19 = arith.constant dense<0.000000e+00> : vector<8xf32>
    %30 = vector.multi_reduction <add>, %29, %cst_19 [1] : vector<8x128xf32> to vector<8xf32>
    %31 = vector.shape_cast %30 : vector<8xf32> to vector<8x1xf32>
    %32 = vector.broadcast %31 : vector<8x1xf32> to vector<8x128xf32>
    %33 = arith.divf %29, %32 : vector<8x128xf32>
    %c4_i32_20 = arith.constant 4 : i32
    %34 = vector.broadcast %c4_i32_20 : i32 to vector<8x128xi32>
    %35 = arith.cmpi eq, %20, %34 : vector<8x128xi32>
    %36 = arith.select %35, %19, %33 : vector<8x128xi1>, vector<8x128xf32>
    %c0_21 = arith.constant 0 : index
    %c0_22 = arith.constant 0 : index
    %37 = vector.load %arg8[%c0_21, %c0_22] : memref<8x128xf32, #tpu.memory_space<vmem>>, vector<8x128xf32>
    tpu.vector_store %arg8[%c0_21, %c0_22], %36 {strides = array<i32>} : memref<8x128xf32, #tpu.memory_space<vmem>>, vector<8x128xf32>,
    return
  }
  func.func @transform_0(%arg0: i32) -> (i32, i32) {
    %c0_i32 = arith.constant 0 : i32
    %c0_i32_0 = arith.constant 0 : i32
    return %arg0, %c0_i32 : i32, i32
  }
  func.func @transform_1(%arg0: i32) -> (i32, i32) {
    %c0_i32 = arith.constant 0 : i32
    %c0_i32_0 = arith.constant 0 : i32
    %c0_i32_1 = arith.constant 0 : i32
    return %c0_i32, %c0_i32_0 : i32, i32
  }
  func.func @transform_2(%arg0: i32) -> (i32, i32) {
    %c0_i32 = arith.constant 0 : i32
    %c0_i32_0 = arith.constant 0 : i32
    %c0_i32_1 = arith.constant 0 : i32
    return %c0_i32, %c0_i32_0 : i32, i32
  }
  func.func @transform_3(%arg0: i32) -> (i32, i32) {
    %c0_i32 = arith.constant 0 : i32
    %c0_i32_0 = arith.constant 0 : i32
    %c0_i32_1 = arith.constant 0 : i32
    return %c0_i32, %c0_i32_0 : i32, i32
  }
  func.func @transform_4(%arg0: i32) -> (i32, i32) {
    %c0_i32 = arith.constant 0 : i32
    %c0_i32_0 = arith.constant 0 : i32
    %c0_i32_1 = arith.constant 0 : i32
    return %c0_i32, %c0_i32_0 : i32, i32
  }
  func.func @transform_5(%arg0: i32) -> (i32, i32) {
    %c0_i32 = arith.constant 0 : i32
    %c0_i32_0 = arith.constant 0 : i32
    %c0_i32_1 = arith.constant 0 : i32
    return %c0_i32, %c0_i32_0 : i32, i32
  }
  func.func @transform_6(%arg0: i32) -> (i32, i32) {
    %c0_i32 = arith.constant 0 : i32
    %c0_i32_0 = arith.constant 0 : i32
    %c0_i32_1 = arith.constant 0 : i32
    return %c0_i32, %c0_i32_0 : i32, i32
  }
  func.func @transform_7(%arg0: i32) -> (i32, i32) {
    %c0_i32 = arith.constant 0 : i32
    %c0_i32_0 = arith.constant 0 : i32
    return %arg0, %c0_i32 : i32, i32
  }
}

</mosaic_0001>

<bundles_post_ra>
// kernel: ppo_forward.1
= control target key start
LH: loop header
LB: loop body
LE: loop exit
PB: predicated region body
PF: predicated region fallthrough
CT: control target
= control target key end

     0   :  { %12 = vsyncpa [#allocation3], 0  ;;  %s630_s0 = inlined_call_operand.vmem [shape: f32[8,4], index: 0, kind: input, shape index: {}]   ;;  %s631_s1 = inlined_call_operand.vmem [shape: f32[4,128], index: 1, kind: input, shape index: {}]   ;;  %s632_s2 = inlined_call_operand.vmem [shape: f32[1,128], index: 2, kind: input, shape index: {}]   ;;  %s633_s3 = inlined_call_operand.hbm [shape: f32[128,128], index: 3, kind: input, shape index: {}]   ;;  %s634_s4 = inlined_call_operand.vmem [shape: f32[1,128], index: 4, kind: input, shape index: {}]   ;;  %s635_s5 = inlined_call_operand.hbm [shape: f32[128,128], index: 5, kind: input, shape index: {}]   ;;  %s636_s6 = inlined_call_operand.vmem [shape: f32[1,128], index: 6, kind: input, shape index: {}]   ;;  %s637_s7 = inlined_call_operand.vmem [shape: f32[8,128], index: 7, kind: output, shape index: {}]  }
   0x1   :  { %13 = vsyncpa [#allocation5], 0  ;;  %s521_s24 = smov [#allocation2]  }
   0x2   :  { %s25_s25 = sshll.u32 %s521_s24, 4  ;;  %s26_s25 = int_to_ptr.vmem [resolvable:$true] %s25_s25 }
   0x3   :  { %s485_s26 = scalar_lea.vmem %s26_s25, 2048  ;;  %p490_p1 = scmp.lt.s32.totalorder %s26_s25, %s26_s25 }
   0x4   :  { %p486_p0 = scmp.ne.s32.totalorder %s26_s25, %s485_s26  ;;  %p491_p2 = scmp.lt.s32.totalorder %s485_s26, %s485_s26 }
   0x6   :  { %p492_p3 = por %p491_p2, %p490_p1 }
   0x8   :  { %p493_p4 = pnand %p492_p3, %p486_p0 }
   0xa   :  { %496 = shalt.err (!%p493_p4)
}
   0xb   :  { %s522_s27 = smov 128   ;;  %s523_s28 = smov 8  }
   0xc   :  { %31 = dma.hbm_to_vmem [thread:$0]  %s633_s3, 2048, %s26_s25, [#allocation3], %s522_s27, %s522_s27, %s523_s28  }
   0xd   :  { %s524_s8 = smov [#allocation4]  }
   0xe   :  { %s39_s9 = sshll.u32 %s524_s8, 4  ;;  %s40_s9 = int_to_ptr.vmem [resolvable:$true] %s39_s9 }
   0xf   :  { %s505_s10 = scalar_lea.vmem %s40_s9, 2048  ;;  %p510_p6 = scmp.lt.s32.totalorder %s40_s9, %s40_s9 }
  0x10   :  { %p506_p5 = scmp.ne.s32.totalorder %s40_s9, %s505_s10  ;;  %p511_p7 = scmp.lt.s32.totalorder %s505_s10, %s505_s10 }
  0x12   :  { %p512_p8 = por %p511_p7, %p510_p6 }
  0x14   :  { %p513_p9 = pnand %p512_p8, %p506_p5 }
  0x16   :  { %516 = shalt.err (!%p513_p9)
}
  0x17   :  { %45 = dma.hbm_to_vmem [thread:$0]  %s635_s5, 2048, %s40_s9, [#allocation5], %s522_s27, %s522_s27, %s523_s28  }
  0x18   :  { %517 = dma.done.wait [#allocation3], 2048  }
  0x19   :  { %518 = vsyncadd [#allocation3], 4294965248 }
  0x1a   :  { %519 = dma.done.wait [#allocation5], 2048  }
  0x1b   :  { %520 = vsyncadd [#allocation5], 4294965248  ;;  %v525_v0 = vmov 0.0   ;;  %vm526_vm0 = vmmov 0   ;;  %vm67_vm1 = vcmask 1043456   ;;  %vm63_vm2 = vcmask 31744  }
  0x1c   :  { %392 = vmatprep.subr.mxu0 %v525_v0  ;;  %394 = vmatprep.mubr.msk.f32.mxu0 %vm526_vm0, %v525_v0  ;;  %v55_v1 = vld [vmem:[%s631_s1] sm:$0xf]  ;;  %v157_v3 = vld [vmem:[#allocation2 + $0x78] sm:$0xff]  ;;  %v156_v4 = vld [vmem:[#allocation2 + $0x70] sm:$0xff]  ;;  %v329_v45 = vlaneseq }
  0x1d   :  { %397 = vmatprep.subr.mxu1 %v525_v0  ;;  %429 = vmatprep.mubr.msk.f32.mxu1 %vm526_vm0, %v525_v0  ;;  %v54_v2 = vld [vmem:[%s630_s0] sm:$0xff]  ;;  %v155_v5 = vld [vmem:[#allocation2 + $0x68] sm:$0xff]  ;;  %v153_v7 = vld [vmem:[#allocation2 + $0x58] sm:$0xff] }
  0x1e   :  { %393 = vmatpush3.msk.msra.mxu0 %vm67_vm1, %v55_v1  ;;  %398 = vmatpush3.msra.mxu1 %v157_v3  ;;  %v154_v6 = vld [vmem:[#allocation2 + $0x60] sm:$0xff]  ;;  %v152_v8 = vld [vmem:[#allocation2 + $0x50] sm:$0xff]  ;;  %v151_v9 = vld [vmem:[#allocation2 + $0x48] sm:$0xff]  ;;  %v330_v46 = vand.u32 127, %v329_v45 }
  0x1f   :  { %395 = vmatmul.mubr.msk.f32.vlgmr.msra.gmra.mxu0 %vm63_vm2, %v54_v2  ;;  %399 = vmatprep.subr.mxu1 %v525_v0  ;;  %v150_v10 = vld [vmem:[#allocation2 + $0x40] sm:$0xff]  ;;  %v149_v11 = vld [vmem:[#allocation2 + $0x38] sm:$0xff]  ;;  %v148_v12 = vld [vmem:[#allocation2 + $0x30] sm:$0xff] }
  0x20   :  { %400 = vmatpush3.msra.mxu1 %v156_v4  ;;  %432 = vmatprep.subr.mxu0 %v525_v0  ;;  %v147_v13 = vld [vmem:[#allocation2 + $0x28] sm:$0xff]  ;;  %v146_v14 = vld [vmem:[#allocation2 + $0x20] sm:$0xff]  ;;  %v145_v15 = vld [vmem:[#allocation2 + $0x18] sm:$0xff]  ;;  %vm331_vm3 = vcmp.lt.s32.totalorder %v330_v46, 4  ;;  %vm342_vm4 = vcmp.eq.s32.totalorder %v330_v46, 4 }
  0x21   :  { %401 = vmatprep.subr.mxu1 %v525_v0  ;;  %464 = vmatprep.mubr.msk.f32.mxu0 %vm526_vm0, %v525_v0  ;;  %v144_v16 = vld [vmem:[#allocation2 + $0x10] sm:$0xff]  ;;  %v143_v17 = vld [vmem:[#allocation2 + $0x8] sm:$0xff]  ;;  %v142_v18 = vld [vmem:[#allocation2] sm:$0xff] }
  0x22   :  { %402 = vmatpush3.msra.mxu1 %v155_v5  ;;  %v251_v19 = vld [vmem:[#allocation4 + $0x78] sm:$0xff]  ;;  %v250_v20 = vld [vmem:[#allocation4 + $0x70] sm:$0xff]  ;;  %v249_v21 = vld [vmem:[#allocation4 + $0x68] sm:$0xff] }
  0x23   :  { %403 = vmatprep.subr.mxu1 %v525_v0  ;;  %433 = vmatpush3.msra.mxu0 %v251_v19  ;;  %v248_v22 = vld [vmem:[#allocation4 + $0x60] sm:$0xff]  ;;  %v247_v23 = vld [vmem:[#allocation4 + $0x58] sm:$0xff]  ;;  %v246_v24 = vld [vmem:[#allocation4 + $0x50] sm:$0xff] }
  0x24   :  { %404 = vmatpush3.msra.mxu1 %v154_v6  ;;  %434 = vmatprep.subr.mxu0 %v525_v0  ;;  %v245_v25 = vld [vmem:[#allocation4 + $0x48] sm:$0xff]  ;;  %v244_v26 = vld [vmem:[#allocation4 + $0x40] sm:$0xff]  ;;  %v243_v27 = vld [vmem:[#allocation4 + $0x38] sm:$0xff] }
  0x25   :  { %405 = vmatprep.subr.mxu1 %v525_v0  ;;  %435 = vmatpush3.msra.mxu0 %v250_v20  ;;  %v242_v28 = vld [vmem:[#allocation4 + $0x30] sm:$0xff]  ;;  %v241_v29 = vld [vmem:[#allocation4 + $0x28] sm:$0xff]  ;;  %v240_v30 = vld [vmem:[#allocation4 + $0x20] sm:$0xff] }
  0x26   :  { %406 = vmatpush3.msra.mxu1 %v153_v7  ;;  %436 = vmatprep.subr.mxu0 %v525_v0  ;;  %v239_v31 = vld [vmem:[#allocation4 + $0x18] sm:$0xff]  ;;  %v351_v32 = vld [vmem:[%s632_s2] ss:$0 sm:$0xff]  ;;  %v238_v37 = vld [vmem:[#allocation4 + $0x10] sm:$0xff] }
  0x27   :  { %407 = vmatprep.subr.mxu1 %v525_v0  ;;  %437 = vmatpush3.msra.mxu0 %v249_v21  ;;  %v237_v38 = vld [vmem:[#allocation4 + $0x8] sm:$0xff]  ;;  %v236_v39 = vld [vmem:[#allocation4] sm:$0xff] }
  0x28   :  { %408 = vmatpush3.msra.mxu1 %v152_v8  ;;  %438 = vmatprep.subr.mxu0 %v525_v0  ;;  %v354_v40 = vld [vmem:[%s634_s4] ss:$0 sm:$0xff] }
  0x29   :  { %409 = vmatprep.subr.mxu1 %v525_v0  ;;  %439 = vmatpush3.msra.mxu0 %v248_v22  ;;  %v355_v47 = vld [vmem:[%s636_s6] ss:$0 sm:$0xff] }
  0x2a   :  { %410 = vmatpush3.msra.mxu1 %v151_v9  ;;  %440 = vmatprep.subr.mxu0 %v525_v0 }
  0x2b   :  { %411 = vmatprep.subr.mxu1 %v525_v0  ;;  %441 = vmatpush3.msra.mxu0 %v247_v23 }
  0x2c   :  { %412 = vmatpush3.msra.mxu1 %v150_v10  ;;  %442 = vmatprep.subr.mxu0 %v525_v0 }
  0x2d   :  { %413 = vmatprep.subr.mxu1 %v525_v0  ;;  %443 = vmatpush3.msra.mxu0 %v246_v24 }
  0x2e   :  { %414 = vmatpush3.msra.mxu1 %v149_v11  ;;  %444 = vmatprep.subr.mxu0 %v525_v0 }
  0x2f   :  { %415 = vmatprep.subr.mxu1 %v525_v0  ;;  %445 = vmatpush3.msra.mxu0 %v245_v25 }
  0x30   :  { %416 = vmatpush3.msra.mxu1 %v148_v12  ;;  %446 = vmatprep.subr.mxu0 %v525_v0 }
  0x31   :  { %417 = vmatprep.subr.mxu1 %v525_v0  ;;  %447 = vmatpush3.msra.mxu0 %v244_v26 }
  0x32   :  { %418 = vmatpush3.msra.mxu1 %v147_v13  ;;  %448 = vmatprep.subr.mxu0 %v525_v0 }
  0x33   :  { %419 = vmatprep.subr.mxu1 %v525_v0  ;;  %449 = vmatpush3.msra.mxu0 %v243_v27 }
  0x34   :  { %420 = vmatpush3.msra.mxu1 %v146_v14  ;;  %450 = vmatprep.subr.mxu0 %v525_v0 }
  0x35   :  { %421 = vmatprep.subr.mxu1 %v525_v0  ;;  %451 = vmatpush3.msra.mxu0 %v242_v28 }
  0x36   :  { %422 = vmatpush3.msra.mxu1 %v145_v15  ;;  %452 = vmatprep.subr.mxu0 %v525_v0 }
  0x37   :  { %423 = vmatprep.subr.mxu1 %v525_v0  ;;  %453 = vmatpush3.msra.mxu0 %v241_v29 }
  0x38   :  { %424 = vmatpush3.msra.mxu1 %v144_v16  ;;  %454 = vmatprep.subr.mxu0 %v525_v0 }
  0x39   :  { %425 = vmatprep.subr.mxu1 %v525_v0  ;;  %455 = vmatpush3.msra.mxu0 %v240_v30 }
  0x3a   :  { %426 = vmatpush3.msra.mxu1 %v143_v17  ;;  %456 = vmatprep.subr.mxu0 %v525_v0 }
  0x3b   :  { %427 = vmatprep.subr.mxu1 %v525_v0  ;;  %457 = vmatpush3.msra.mxu0 %v239_v31 }
  0x3c   :  { %428 = vmatpush3.msra.mxu1 %v142_v18  ;;  %458 = vmatprep.subr.mxu0 %v525_v0 }
  0x3d   :  { %459 = vmatpush3.msra.mxu0 %v238_v37 }
  0x3e   :  { %460 = vmatprep.subr.mxu0 %v525_v0 }
  0x3f   :  { %461 = vmatpush3.msra.mxu0 %v237_v38 }
  0x40   :  { %462 = vmatprep.subr.mxu0 %v525_v0 }
  0x41   :  { %463 = vmatpush3.msra.mxu0 %v236_v39 }
  0xdf   :  { %v137_v33 = vpop.f32.mrf.mxu0 }
  0xe0   :  { %v138_v34 = vadd.f32 %v351_v32, %v137_v33 }
  0xe1   :  { %v396_v35 = vpop.f32.mrf.mxu0 }
  0xe2   :  { %v141_v36 = vmax.f32 %v138_v34, 0.0 }
  0xe4   :  { %430 = vmatmul.mubr.f32.vlgmr.msra.gmra.mxu1 %v141_v36 }
 0x1a4   :  { %v231_v41 = vpop.f32.mrf.mxu1 }
 0x1a5   :  { %v232_v42 = vadd.f32 %v354_v40, %v231_v41 }
 0x1a6   :  { %v431_v43 = vpop.f32.mrf.mxu1 }
 0x1a7   :  { %v235_v44 = vmax.f32 %v232_v42, 0.0 }
 0x1a9   :  { %465 = vmatmul.mubr.f32.vlgmr.msra.gmra.mxu0 %v235_v44 }
 0x269   :  { %v325_v48 = vpop.f32.mrf.mxu0 }
 0x26a   :  { %v326_v49 = vadd.f32 %v355_v47, %v325_v48 }
 0x26b   :  { %v466_v50 = vpop.f32.mrf.mxu0 }
 0x26c   :  { %v332_v51 = vsel %vm331_vm3, %v326_v49, -inf }
 0x26d   :  { %333 = vmax.xlane.f32.xlu0 %v332_v51 }
 0x2f6   :  { %v334_v52 = vpop.xlane.xlu0 %333 }
 0x2f7   :  { %v335_v53 = vsub.f32 %v332_v51, %v334_v52 }
 0x2f9   :  { %v336_v54 = vmul.f32 1.442695, %v335_v53 }
 0x2fb   :  { %473 = vpow2.f32 %v336_v54 }
 0x308   :  { %v474_v55 = vpop.eup %473 }
 0x309   :  { %338 = vadd.xlane.f32.xlu0 %v474_v55 }
 0x392   :  { %v339_v56 = vpop.xlane.xlu0 %338 }
 0x393   :  { %475 = vrcp.f32 %v339_v56 }
 0x3a0   :  { %v476_v57 = vpop.eup %475 }
 0x3a1   :  { %v341_v58 = vmul.f32 %v476_v57, %v474_v55 }
 0x3a3   :  { %v343_v59 = vsel %vm342_vm4, %v326_v49, %v341_v58 }
 0x3a4   :  { %344 = vst [vmem:[%s637_s7] sm:$0xff] %v343_v59 }
 0x3a5   :  { %349 = vsyncpa [#allocation3], 1 }
 0x3a6   :  { %350 = vsyncpa [#allocation5], 1 }

</bundles_post_ra>
